<compile_context>
chip_gen: v5e
topology: v5e:2x2
jax: 0.10.0
libtpu: 0.0.40
codegen_flags: <defaults>
</compile_context>

<pallas_src>
import jax
import jax.numpy as jnp
from jax.experimental import pallas as pl
from jax.experimental.pallas import tpu as pltpu

ALPHA_PHYSICS = 0.1
ALPHA_SMOOTHNESS = 0.05

_LANES = 128
_SUBLANES = 8


# ----------------------------------------------------------------------------
# Per-generation VMEM budget / tile sizing
# ----------------------------------------------------------------------------
def _pick_vmem_limit_bytes():
    """~75% of physical per-core VMEM, capped at 64 MiB.

    v7x: 64 MiB physical -> 48 MiB limit.  v5e/v6e: 128 MiB -> 64 MiB limit
    (already well past the BW-saturation point for this mem-bound kernel).
    Falls back to the smallest generation (v7x) if the query is unavailable.
    """
    cap = 64 * 1024 * 1024
    try:
        info = pltpu.get_tpu_info()
        for name in ("vmem_capacity_bytes", "vmem_size_bytes", "vmem_bytes"):
            v = getattr(info, name, None)
            if v:
                cap = int(v)
                break
    except Exception:
        pass
    return max(32 * 1024 * 1024, min(int(cap * 0.75), 64 * 1024 * 1024))


def _pick_block_rows(n_stations, n_timepoints, itemsize, vmem_limit_bytes):
    """Station-tile rows for the streamed Huber term (byte-based sizing).

    Per grid step the VMEM footprint is 2 inputs x 2 pipeline buffers in the
    native dtype plus ~4 full-tile f32 temporaries (casts/diff/|diff|/huber)
    that Mosaic materializes; keep that within ~80% of vmem_limit_bytes.
    """
    sub_pack = _SUBLANES * max(1, 4 // itemsize)      # 8 f32, 16 bf16, 32 int8/fp8
    row_native = n_timepoints * itemsize
    row_f32 = n_timepoints * 4
    bytes_per_row = 4 * row_native + 4 * row_f32
    usable = int(vmem_limit_bytes * 0.8)              # headroom: outputs, compiler scratch
    vmem_rows = max(sub_pack, usable // bytes_per_row)

    # Bandwidth floor: >= ~4 MiB per streamed input buffer (hides ~0.35us/step).
    bw_rows = -(-(4 * 1024 * 1024) // row_native)
    # Balance target: >= 4 grid steps so the "parallel" axis feeds both v7x TCs,
    # but never below the bandwidth floor.
    balance_rows = -(-n_stations // 4)
    target_rows = max(bw_rows, balance_rows)

    rows = min(vmem_rows, target_rows)
    if rows >= n_stations:
        return n_stations                              # single resident block
    return max(sub_pack, (rows // sub_pack) * sub_pack)


# ----------------------------------------------------------------------------
# Streaming smooth-L1 (Huber) kernel: per-block partial sums
# ----------------------------------------------------------------------------
def _make_huber_kernel(n_stations, block_rows, n_timepoints):
    needs_mask = (n_stations % block_rows) != 0
    vector_partials = (block_rows % _SUBLANES == 0) and (n_timepoints % _LANES == 0)

    def kernel(pred_ref, targ_ref, hpart_ref):
        i = pl.program_id(0)
        pred = pred_ref[...].astype(jnp.float32)   # cast on the VMEM tile, not in HBM
        targ = targ_ref[...].astype(jnp.float32)
        diff = pred - targ
        if needs_mask:
            # Ragged station tail: rows past n_stations hold garbage -> zero them.
            row = jax.lax.broadcasted_iota(jnp.int32, diff.shape, 0) + i * block_rows
            diff = jnp.where(row < n_stations, diff, 0.0)
        adiff = jnp.abs(diff)
        huber = jnp.where(adiff < 1.0, 0.5 * diff * diff, adiff - 0.5)

        if vector_partials:
            # VALU-only partial reduction: fold sublane groups -> (8, T), then lane
            # groups -> (8, 128), using tile-aligned static slices + vreg adds only
            # (no cross-lane XLU reduce, no per-step scalar broadcast).
            rows8 = huber[0:_SUBLANES, :]
            for r in range(1, block_rows // _SUBLANES):
                rows8 = rows8 + huber[r * _SUBLANES:(r + 1) * _SUBLANES, :]
            partial = rows8[:, 0:_LANES]
            for c in range(1, n_timepoints // _LANES):
                partial = partial + rows8[:, c * _LANES:(c + 1) * _LANES]
            hpart_ref[...] = partial.reshape(1, _SUBLANES, _LANES)
        else:
            # Fallback for tiles not aligned to (8,128): scalar reduce + broadcast.
            hpart_ref[...] = jnp.full(hpart_ref.shape, jnp.sum(huber), jnp.float32)

    return kernel, vector_partials


# ----------------------------------------------------------------------------
# One-shot regularizer kernel (physics + smoothness), off the hot loop
# ----------------------------------------------------------------------------
def _reg_kernel(trend_ref, amps_ref, out_ref):
    trend = trend_ref[...].astype(jnp.float32)     # (1, S)   stations -> lanes
    amps = amps_ref[...].astype(jnp.float32)       # (A, S)   stations -> lanes
    s = trend.shape[-1]
    n_amp = amps.shape[0]

    # physics: mean(relu(sum_a amps - 3*|trend| - 10)) over stations
    mag = jnp.sum(amps, axis=0, keepdims=True)
    pen = jnp.maximum(mag - 3.0 * jnp.abs(trend) - 10.0, 0.0)
    physics = jnp.sum(pen) / s

    # smoothness: neighboring-station differences along the lane axis
    td = trend[:, 1:] - trend[:, :-1]
    ad = amps[:, 1:] - amps[:, :-1]
    trend_smooth = jnp.sum(td * td) / (s - 1)
    amp_smooth = jnp.sum(ad * ad) / (n_amp * (s - 1))

    out_ref[0] = ALPHA_PHYSICS * physics + ALPHA_SMOOTHNESS * (trend_smooth + amp_smooth)


# ----------------------------------------------------------------------------
# Wrapper
# ----------------------------------------------------------------------------
def insar_loss(predicted, target, linear_trend, seasonal_amplitudes, *, block_rows=None):
    """predicted/target: [S, T]; linear_trend: [S]; seasonal_amplitudes: [S, 4]."""
    S, T = predicted.shape
    if S < 2:
        # The PyTorch reference's smoothness term is a mean over an empty diff (NaN)
        # for S == 1; require S >= 2 rather than reproduce that degenerate case.
        raise ValueError("insar_loss requires at least 2 stations")

    itemsize = jnp.dtype(predicted.dtype).itemsize
    vmem_limit = _pick_vmem_limit_bytes()
    if block_rows is None:
        block_rows = _pick_block_rows(S, T, itemsize, vmem_limit)
    num_blocks = pl.cdiv(S, block_rows)

    kernel, vector_partials = _make_huber_kernel(S, block_rows, T)

    grid_spec = pltpu.PrefetchScalarGridSpec(
        num_scalar_prefetch=0,
        grid=(num_blocks,),
        in_specs=[
            pl.BlockSpec((block_rows, T), lambda i: (i, 0)),   # streamed, double-buffered
            pl.BlockSpec((block_rows, T), lambda i: (i, 0)),   # streamed, double-buffered
        ],
        out_specs=pl.BlockSpec((1, _SUBLANES, _LANES), lambda i: (i, 0, 0)),
    )

    cost = pl.CostEstimate(
        flops=6 * S * T,
        transcendentals=0,
        bytes_accessed=2 * S * T * itemsize + num_blocks * _SUBLANES * _LANES * 4,
    )

    hpart = pl.pallas_call(
        kernel,
        grid_spec=grid_spec,
        out_shape=jax.ShapeDtypeStruct((num_blocks, _SUBLANES, _LANES), jnp.float32),
        compiler_params=pltpu.CompilerParams(
            dimension_semantics=("parallel",),
            vmem_limit_bytes=vmem_limit,
        ),
        cost_estimate=cost,
    )(predicted, target)

    # Tiny final reduction over per-block partials (negligible; keeps the station
    # axis 'parallel' so both v7x TensorCores stream independently).
    if vector_partials:
        primary = jnp.sum(hpart) / (S * T)
    else:
        primary = jnp.sum(hpart[:, 0, 0]) / (S * T)

    # Regularizers touch only ~5*S floats: one-shot kernel, outside the hot loop.
    trend2d = linear_trend.reshape(1, S)         # stations -> lanes
    amps2d = seasonal_amplitudes.T               # (n_amp, S), stations -> lanes
    reg = pl.pallas_call(
        _reg_kernel,
        out_shape=jax.ShapeDtypeStruct((1,), jnp.float32),
        in_specs=[
            pl.BlockSpec(memory_space=pltpu.MemorySpace.VMEM),
            pl.BlockSpec(memory_space=pltpu.MemorySpace.VMEM),
        ],
        out_specs=pl.BlockSpec(memory_space=pltpu.MemorySpace.SMEM),
    )(trend2d, amps2d)

    return primary + reg[0]


def insar_loss_ref(predicted, target, linear_trend, seasonal_amplitudes):
    diff = predicted.astype(jnp.float32) - target.astype(jnp.float32)
    adiff = jnp.abs(diff)
    primary = jnp.mean(jnp.where(adiff < 1.0, 0.5 * diff * diff, adiff - 0.5))
    seasonal_mag = jnp.sum(seasonal_amplitudes, axis=1)
    physics = jnp.mean(jax.nn.relu(seasonal_mag - 3.0 * jnp.abs(linear_trend) - 10.0))
    trend_smooth = jnp.mean((linear_trend[1:] - linear_trend[:-1]) ** 2)
    amp_smooth = jnp.mean((seasonal_amplitudes[1:] - seasonal_amplitudes[:-1]) ** 2)
    return primary + ALPHA_PHYSICS * physics + ALPHA_SMOOTHNESS * (trend_smooth + amp_smooth)


if __name__ == "__main__":
    def run_case(n_stations, n_timepoints, block_rows=None, seed=0):
        key = jax.random.PRNGKey(seed)
        k_pred, k_targ, k_trend, k_amps = jax.random.split(key, 4)
        predicted = jax.random.normal(k_pred, (n_stations, n_timepoints), jnp.float32) * 2.0
        target = jax.random.normal(k_targ, (n_stations, n_timepoints), jnp.float32) * 2.0
        # InSARSignalModel.__init__ values (trend=0, amps=2.0) plus deterministic
        # perturbations so every term of the loss is exercised.
        linear_trend = 0.5 * jax.random.normal(k_trend, (n_stations,), jnp.float32)
        seasonal_amplitudes = 2.0 + 2.0 * jax.random.uniform(
            k_amps, (n_stations, 4), jnp.float32)

        loss = jax.block_until_ready(
            insar_loss(predicted, target, linear_trend, seasonal_amplitudes,
                       block_rows=block_rows))
        ref = jax.block_until_ready(
            insar_loss_ref(predicted, target, linear_trend, seasonal_amplitudes))
        assert jnp.allclose(loss, ref, rtol=1e-5, atol=1e-5), \
            (n_stations, n_timepoints, loss, ref)

    # Single resident block; exercises the VALU-only (8,128) partial-sum path.
    run_case(16, 128)
    # Multi-block pipelined streaming with a ragged station tail
    # (parallel per-block vector partials + tail masking).
    run_case(20, 128, block_rows=8, seed=1)
    # Non-128-multiple T: exercises the scalar-reduce fallback + ragged tail.
    run_case(40, 96, block_rows=16, seed=2)

    print("KERNEL_OK")
</pallas_src>

<mosaic_0001>
module attributes {stable_mosaic.version = 11 : i64} {
  func.func @kernel(%arg0: i32, %arg1: memref<16x128xf32, #tpu.memory_space<vmem>>, %arg2: memref<16x128xf32, #tpu.memory_space<vmem>>, %arg3: memref<1x8x128xf32, #tpu.memory_space<vmem>>) attributes {dimension_semantics = [#tpu.dimension_semantics<parallel>], iteration_bounds = array<i64: 1>, scalar_prefetch = 0 : i64, scratch_operands = 0 : i64, tpu.core_type = #tpu.core_type<tc>, window_params = [{transform_indices = @transform_0, window_bounds = array<i64: 16, 128>}, {transform_indices = @transform_1, window_bounds = array<i64: 16, 128>}, {transform_indices = @transform_2, window_bounds = array<i64: 1, 8, 128>}]} {
    %c0 = arith.constant 0 : index
    %c0_0 = arith.constant 0 : index
    %0 = vector.load %arg1[%c0, %c0_0] : memref<16x128xf32, #tpu.memory_space<vmem>>, vector<16x128xf32>
    %c0_1 = arith.constant 0 : index
    %c0_2 = arith.constant 0 : index
    %1 = vector.load %arg2[%c0_1, %c0_2] : memref<16x128xf32, #tpu.memory_space<vmem>>, vector<16x128xf32>
    %2 = arith.subf %0, %1 : vector<16x128xf32>
    %3 = math.absf %2 : vector<16x128xf32>
    %cst = arith.constant 1.000000e+00 : f32
    %4 = vector.broadcast %cst : f32 to vector<16x128xf32>
    %5 = arith.cmpf olt, %3, %4 : vector<16x128xf32>
    %cst_3 = arith.constant 5.000000e-01 : f32
    %6 = vector.broadcast %cst_3 : f32 to vector<16x128xf32>
    %7 = arith.mulf %6, %2 : vector<16x128xf32>
    %8 = arith.mulf %7, %2 : vector<16x128xf32>
    %cst_4 = arith.constant 5.000000e-01 : f32
    %9 = vector.broadcast %cst_4 : f32 to vector<16x128xf32>
    %10 = arith.subf %3, %9 : vector<16x128xf32>
    %11 = arith.select %5, %8, %10 : vector<16x128xi1>, vector<16x128xf32>
    %12 = vector.extract_strided_slice %11 {offsets = [0, 0], sizes = [8, 128], strides = [1, 1]} : vector<16x128xf32> to vector<8x128xf32>
    %13 = vector.extract_strided_slice %11 {offsets = [8, 0], sizes = [8, 128], strides = [1, 1]} : vector<16x128xf32> to vector<8x128xf32>
    %14 = arith.addf %12, %13 : vector<8x128xf32>
    %15 = vector.shape_cast %14 : vector<8x128xf32> to vector<1x8x128xf32>
    %c0_5 = arith.constant 0 : index
    %c0_6 = arith.constant 0 : index
    %c0_7 = arith.constant 0 : index
    %16 = vector.load %arg3[%c0_5, %c0_6, %c0_7] : memref<1x8x128xf32, #tpu.memory_space<vmem>>, vector<1x8x128xf32>
    tpu.vector_store %arg3[%c0_5, %c0_6, %c0_7], %15 {strides = array<i32>} : memref<1x8x128xf32, #tpu.memory_space<vmem>>, vector<1x8x128xf32>,
    return
  }
  func.func @transform_0(%arg0: i32) -> (i32, i32) {
    %c0_i32 = arith.constant 0 : i32
    %c0_i32_0 = arith.constant 0 : i32
    return %arg0, %c0_i32 : i32, i32
  }
  func.func @transform_1(%arg0: i32) -> (i32, i32) {
    %c0_i32 = arith.constant 0 : i32
    %c0_i32_0 = arith.constant 0 : i32
    return %arg0, %c0_i32 : i32, i32
  }
  func.func @transform_2(%arg0: i32) -> (i32, i32, i32) {
    %c0_i32 = arith.constant 0 : i32
    %c0_i32_0 = arith.constant 0 : i32
    %c0_i32_1 = arith.constant 0 : i32
    return %arg0, %c0_i32, %c0_i32_0 : i32, i32, i32
  }
}

</mosaic_0001>

<bundles_post_ra>
// kernel: tpu_custom_call.1
= control target key start
LH: loop header
LB: loop body
LE: loop exit
PB: predicated region body
PF: predicated region fallthrough
CT: control target
= control target key end

     0   :  { %7 = vsyncpa [#allocation3], 0  ;;  %s196_s0 = inlined_call_operand.hbm [shape: f32[16,128], index: 0, kind: input, shape index: {}]   ;;  %s197_s1 = inlined_call_operand.hbm [shape: f32[16,128], index: 1, kind: input, shape index: {}]   ;;  %s198_s2 = inlined_call_operand.hbm [shape: f32[1,8,128], index: 2, kind: output, shape index: {}]  }
   0x1   :  { %8 = vsyncpa [#allocation6], 0 }
   0x2   :  { %9 = vsyncpa [#allocation4], 0  ;;  %s14_s11 = sshll.u32 %s196_s0, 4  ;;  %s167_s12 = smov [#allocation2]   ;;  %s15_s11 = int_to_ptr.hbm [resolvable:$true] %s14_s11 }
   0x3   :  { %s16_s13 = sshll.u32 %s167_s12, 4  ;;  %s27_s16 = sshll.u32 %s197_s1, 4  ;;  %s17_s13 = int_to_ptr.vmem [resolvable:$true] %s16_s13  ;;  %s28_s16 = int_to_ptr.hbm [resolvable:$true] %s27_s16 }
   0x4   :  { %s168_s17 = smov 128   ;;  %s169_s18 = smov 8  }
   0x5   :  { %22 = dma.hbm_to_vmem [thread:$0]  %s15_s11, 256, %s17_s13, [#allocation3], %s168_s17, %s168_s17, %s169_s18  }
   0x6   :  { %s170_s19 = smov [#allocation5]  }
   0x7   :  { %s29_s20 = sshll.u32 %s170_s19, 4  ;;  %s30_s20 = int_to_ptr.vmem [resolvable:$true] %s29_s20 }
   0x8   :  { %35 = dma.hbm_to_vmem [thread:$0]  %s28_s16, 256, %s30_s20, [#allocation6], %s168_s17, %s168_s17, %s169_s18  }
   0x9   :  { %161 = dma.done.wait [#allocation3], 256  }
   0xa   :  { %162 = vsyncadd [#allocation3], 4294967040 }
   0xb   :  { %163 = dma.done.wait [#allocation6], 256  }
   0xc   :  { %164 = vsyncadd [#allocation6], 4294967040  ;;  %v44_v0 = vld [vmem:[#allocation2] sm:$0xff]  ;;  %v45_v1 = vld [vmem:[#allocation2 + $0x8] sm:$0xff]  ;;  %s171_s0 = smov [#allocation7]   ;;  %s71_s23 = sshll.u32 %s198_s2, 4  ;;  %s72_s23 = int_to_ptr.hbm [resolvable:$true] %s71_s23 }
   0xd   :  { %v46_v2 = vld [vmem:[#allocation5] sm:$0xff]  ;;  %v47_v3 = vld [vmem:[#allocation5 + $0x8] sm:$0xff]  ;;  %s69_s1 = sshll.u32 %s171_s0, 4  ;;  %s70_s1 = int_to_ptr.vmem [resolvable:$true] %s69_s1 }
   0xe   :  { %v48_v4 = vsub.f32 %v44_v0, %v46_v2  ;;  %v49_v5 = vsub.f32 %v45_v1, %v47_v3 }
  0x10   :  { %v50_v6 = vand.u32 2147483647, %v48_v4  ;;  %v54_v7 = vmul.f32 0.5, %v48_v4  ;;  %v51_v8 = vand.u32 2147483647, %v49_v5  ;;  %v55_v9 = vmul.f32 0.5, %v49_v5 }
  0x12   :  { %vm52_vm0 = vcmp.lt.f32.partialorder %v50_v6, 1.0  ;;  %v56_v10 = vmul.f32 %v54_v7, %v48_v4  ;;  %v82_v11 = vadd.f32 -0.5, %v50_v6  ;;  %vm53_vm1 = vcmp.lt.f32.partialorder %v51_v8, 1.0 }
  0x13   :  { %v57_v12 = vmul.f32 %v55_v9, %v49_v5  ;;  %v83_v13 = vadd.f32 -0.5, %v51_v8 }
  0x14   :  { %v60_v14 = vsel %vm52_vm0, %v56_v10, %v82_v11 }
  0x15   :  { %v61_v15 = vsel %vm53_vm1, %v57_v12, %v83_v13 }
  0x16   :  { %v62_v16 = vadd.f32 %v61_v15, %v60_v14 }
  0x18   :  { %63 = vst [vmem:[#allocation7] sm:$0xff] %v62_v16 }
  0x19   :  { %74 = dma.vmem_to_hbm [thread:$0]  %s70_s1, 128, %s72_s23, [#allocation4]  }
  0x1a   :  { %165 = dma.done.wait [#allocation4], 128  }
  0x1b   :  { %166 = vsyncadd [#allocation4], 4294967168 }
  0x1c   :  { %79 = vsyncpa [#allocation3], 1 }
  0x1d   :  { %80 = vsyncpa [#allocation6], 1 }
  0x1e   :  { %81 = vsyncpa [#allocation4], 1 }

</bundles_post_ra>
